<compile_context>
chip_gen: v7x
topology: tpu7x:2x2x1
jax: 0.10.0
libtpu: 0.0.40
codegen_flags: <defaults>
</compile_context>

<pallas_src>
import functools

import jax
import jax.numpy as jnp
from jax.experimental import pallas as pl
from jax.experimental.pallas import tpu as pltpu


_VMEM_LIMIT_BYTES = 48 * 1024 * 1024     # explicit scoped-VMEM limit (fits v7x 64 MiB phys)
_VMEM_BUDGET_BYTES = 40 * 1024 * 1024    # tile-sizing budget (inputs + temporaries)
_TARGET_WINDOW_BYTES = 4 * 1024 * 1024   # streamed logits window per grid step
_MAX_TILE_ROWS = 8192                    # review: raise the old 1024-row cap


def _row_losses(x, t, *, confidence: float, smoothing: float, n_valid: int):
    """Masked per-row label-smoothed CE losses for one (TILE_N, C) tile.

    x : (TILE_N, C) logits (native dtype), t : (TILE_N, 1) int32 targets.
    Returns (TILE_N, 1) f32 losses, exactly 0.0 for padded / out-of-range rows.
    """
    tile_n, c = x.shape
    uni = smoothing / float(c)

    # (1, C) class-index iota, broadcast against (TILE_N, 1) targets.
    col = jax.lax.broadcasted_iota(jnp.int32, (1, c), 1)
    onehot = col == t                                            # (TILE_N, C) bool

    if x.dtype == jnp.float32:
        xf = x
        m = jnp.max(xf, axis=-1, keepdims=True)                              # (TILE_N, 1)
        se = jnp.sum(jnp.exp(xf - m), axis=-1, keepdims=True)                # (TILE_N, 1)
        w = jnp.where(onehot, confidence + uni, uni)                         # f32 weights
        wx = jnp.sum(w * xf, axis=-1, keepdims=True)                         # (TILE_N, 1)
    else:
        # bf16-style path (v6e/v7x have bf16 VPUs): keep max + weighted product
        # in the native dtype, accumulate exp-sum and weighted-sum in f32.
        m = jnp.max(x, axis=-1, keepdims=True)
        se = jnp.sum(jnp.exp((x - m).astype(jnp.float32)),
                     axis=-1, keepdims=True)
        on_w = jnp.asarray(confidence + uni, dtype=x.dtype)
        off_w = jnp.asarray(uni, dtype=x.dtype)
        w = jnp.where(onehot, on_w, off_w)
        wx = jnp.sum(w * x, axis=-1, keepdims=True, dtype=jnp.float32)
        m = m.astype(jnp.float32)

    lse = m + jnp.log(se)
    loss = lse - wx                                                          # (TILE_N, 1)

    # Mask rows past the real batch BEFORE anything downstream reduces them.
    row = (jax.lax.broadcasted_iota(jnp.int32, (tile_n, 1), 0)
           + pl.program_id(0) * tile_n)
    return jnp.where(row < n_valid, loss, 0.0)


def _ls_ce_kernel(x_ref, t_ref, loss_ref, *, confidence: float,
                  smoothing: float, n_valid: int):
    loss_ref[...] = _row_losses(x_ref[...], t_ref[...],
                                confidence=confidence, smoothing=smoothing,
                                n_valid=n_valid)


def _vmem_estimate(tile_n: int, c: int, itemsize: int) -> int:
    in_tiles = 2 * tile_n * c * itemsize        # double-buffered logits window
    f32_tmps = 5 * tile_n * c * 4               # conservative in-kernel f32 temporaries
    small = 4 * tile_n * 4 * 4                  # targets / per-row columns (negligible)
    return in_tiles + f32_tmps + small


def _choose_tile_n(n: int, c: int, itemsize: int) -> int:
    """Byte-driven batch-tile size: ~4 MiB window, multiple of 8 rows, and
    shrunk until the estimated live VMEM fits the generation-aware budget."""
    n_up = ((n + 7) // 8) * 8
    tile = _TARGET_WINDOW_BYTES // max(1, c * itemsize)
    tile = max(8, min(_MAX_TILE_ROWS, (tile // 8) * 8))
    while tile > 8 and _vmem_estimate(tile, c, itemsize) > _VMEM_BUDGET_BYTES:
        tile = max(8, ((tile // 2) // 8) * 8)
    tile = min(tile, n_up)
    # Megacore (v7x): guarantee >= 2 grid steps whenever the batch allows it so
    # dimension_semantics=("parallel",) can shard work across both TensorCores.
    if tile >= n_up and n_up >= 16:
        tile = max(8, ((n_up + 15) // 16) * 8)   # ~half the batch, 8-row aligned
    return tile


def label_smoothing_cross_entropy(x, target, smoothing: float = 0.1,
                                  reduction: str = "mean",
                                  tile_n: int | None = None):
    """Pallas wrapper. x: (N, C) float logits, target: (N,) int labels."""
    if reduction not in ("mean", "sum", "none"):
        raise ValueError(f"Unsupported reduction: {reduction}")
    n, c = x.shape
    confidence = 1.0 - smoothing
    itemsize = jnp.dtype(x.dtype).itemsize
    if tile_n is None:
        tile_n = _choose_tile_n(n, c, itemsize)
    num_tiles = (n + tile_n - 1) // tile_n
    n_pad = num_tiles * tile_n

    t2d = target.astype(jnp.int32).reshape(n, 1)

    kernel = functools.partial(_ls_ce_kernel,
                               confidence=float(confidence),
                               smoothing=float(smoothing),
                               n_valid=int(n))

    cost = pl.CostEstimate(
        flops=5 * n * c,                       # sub, exp-arg, sum, w*x, wx-sum (approx)
        transcendentals=n * c + n,             # exp per element + log per row
        bytes_accessed=n * c * itemsize + n * 4 + n_pad * 4,
    )

    rows = pl.pallas_call(
        kernel,
        out_shape=jax.ShapeDtypeStruct((n_pad, 1), jnp.float32),
        grid=(num_tiles,),
        in_specs=[
            pl.BlockSpec((tile_n, c), lambda i: (i, 0)),   # logits tile (lane-dense)
            pl.BlockSpec((tile_n, 1), lambda i: (i, 0)),   # target column tile
        ],
        out_specs=pl.BlockSpec((tile_n, 1), lambda i: (i, 0)),
        compiler_params=pltpu.CompilerParams(
            dimension_semantics=("parallel",),             # megacore-shardable on v7x
            vmem_limit_bytes=_VMEM_LIMIT_BYTES),
        cost_estimate=cost,
    )(x, t2d)

    if reduction == "mean":
        # Padded rows are exactly 0, so reduce the padded column directly.
        return jnp.sum(rows) / float(n)
    elif reduction == "sum":
        return jnp.sum(rows)
    else:  # 'none'
        return rows[:n, 0]


def _reference(x, target, smoothing=0.1, reduction="mean"):
    logprobs = jax.nn.log_softmax(x.astype(jnp.float32), axis=-1)
    nll = -jnp.take_along_axis(logprobs, target[:, None].astype(jnp.int32),
                               axis=-1)[:, 0]
    smooth = -jnp.mean(logprobs, axis=-1)
    loss = (1.0 - smoothing) * nll + smoothing * smooth
    if reduction == "mean":
        return jnp.mean(loss)
    elif reduction == "sum":
        return jnp.sum(loss)
    return loss


if __name__ == "__main__":
    key = jax.random.PRNGKey(0)
    kx, kt = jax.random.split(key)

    # Small shapes consistent with the (N, C) logits / (N,) labels module.
    N, C = 8, 32
    x = jax.random.normal(kx, (N, C), dtype=jnp.float32)
    target = jax.random.randint(kt, (N,), 0, C, dtype=jnp.int32)

    for red in ("mean", "sum", "none"):
        out = label_smoothing_cross_entropy(x, target, smoothing=0.1, reduction=red)
        out = jax.block_until_ready(out)
        ref = _reference(x, target, smoothing=0.1, reduction=red)
        assert jnp.allclose(out, ref, atol=1e-5, rtol=1e-5), (red, out, ref)

    # Ragged batch (N % TILE_N != 0) to exercise the remainder-row masking and
    # the >=2-tile megacore split.
    N2, C2 = 13, 32
    x2 = jax.random.normal(kx, (N2, C2), dtype=jnp.float32)
    t2 = jax.random.randint(kt, (N2,), 0, C2, dtype=jnp.int32)
    out2 = jax.block_until_ready(
        label_smoothing_cross_entropy(x2, t2, smoothing=0.1, reduction="mean"))
    ref2 = _reference(x2, t2, smoothing=0.1, reduction="mean")
    assert jnp.allclose(out2, ref2, atol=1e-5, rtol=1e-5), (out2, ref2)

    # bf16 logits exercise the native-dtype (bf16 VPU) path; compare against the
    # f32 reference on the same (upcast) values with a bf16-appropriate tolerance.
    xb = x.astype(jnp.bfloat16)
    outb = jax.block_until_ready(
        label_smoothing_cross_entropy(xb, target, smoothing=0.1, reduction="mean"))
    refb = _reference(xb.astype(jnp.float32), target, smoothing=0.1, reduction="mean")
    assert jnp.allclose(outb, refb, atol=5e-2, rtol=5e-2), (outb, refb)

    print("KERNEL_OK")
</pallas_src>

<mosaic_0001>
module attributes {stable_mosaic.version = 11 : i64} {
  func.func @_ls_ce_kernel(%arg0: i32, %arg1: memref<8x32xf32, #tpu.memory_space<vmem>>, %arg2: memref<8x1xi32, #tpu.memory_space<vmem>>, %arg3: memref<8x1xf32, #tpu.memory_space<vmem>>) attributes {dimension_semantics = [#tpu.dimension_semantics<parallel>], iteration_bounds = array<i64: 1>, scalar_prefetch = 0 : i64, scratch_operands = 0 : i64, tpu.core_type = #tpu.core_type<tc>, window_params = [{transform_indices = @transform_0, window_bounds = array<i64: 8, 32>}, {transform_indices = @transform_1, window_bounds = array<i64: 8, 1>}, {transform_indices = @transform_2, window_bounds = array<i64: 8, 1>}]} {
    %c0 = arith.constant 0 : index
    %c0_0 = arith.constant 0 : index
    %0 = vector.load %arg1[%c0, %c0_0] : memref<8x32xf32, #tpu.memory_space<vmem>>, vector<8x32xf32>
    %c0_1 = arith.constant 0 : index
    %c0_2 = arith.constant 0 : index
    %1 = vector.load %arg2[%c0_1, %c0_2] : memref<8x1xi32, #tpu.memory_space<vmem>>, vector<8x1xi32>
    %2 = tpu.iota {dimensions = array<i32: 1>} : vector<1x32xi32>
    %3 = vector.broadcast %2 : vector<1x32xi32> to vector<8x32xi32>
    %4 = vector.broadcast %1 : vector<8x1xi32> to vector<8x32xi32>
    %5 = arith.cmpi eq, %3, %4 : vector<8x32xi32>
    %cst = arith.constant dense<0xFF800000> : vector<8xf32>
    %6 = vector.multi_reduction <maximumf>, %0, %cst [1] : vector<8x32xf32> to vector<8xf32>
    %7 = vector.shape_cast %6 : vector<8xf32> to vector<8x1xf32>
    %8 = vector.broadcast %7 : vector<8x1xf32> to vector<8x32xf32>
    %9 = arith.subf %0, %8 : vector<8x32xf32>
    %10 = math.exp %9 : vector<8x32xf32>
    %cst_3 = arith.constant dense<0.000000e+00> : vector<8xf32>
    %11 = vector.multi_reduction <add>, %10, %cst_3 [1] : vector<8x32xf32> to vector<8xf32>
    %12 = vector.shape_cast %11 : vector<8xf32> to vector<8x1xf32>
    %cst_4 = arith.constant 0.903124988 : f32
    %cst_5 = arith.constant 3.125000e-03 : f32
    %13 = vector.broadcast %cst_4 : f32 to vector<8x32xf32>
    %14 = vector.broadcast %cst_5 : f32 to vector<8x32xf32>
    %15 = arith.select %5, %13, %14 : vector<8x32xi1>, vector<8x32xf32>
    %16 = arith.mulf %15, %0 : vector<8x32xf32>
    %cst_6 = arith.constant dense<0.000000e+00> : vector<8xf32>
    %17 = vector.multi_reduction <add>, %16, %cst_6 [1] : vector<8x32xf32> to vector<8xf32>
    %18 = vector.shape_cast %17 : vector<8xf32> to vector<8x1xf32>
    %19 = math.log %12 : vector<8x1xf32>
    %20 = arith.addf %7, %19 : vector<8x1xf32>
    %21 = arith.subf %20, %18 : vector<8x1xf32>
    %22 = tpu.iota {dimensions = array<i32: 0>} : vector<8x1xi32>
    %c8_i32 = arith.constant 8 : i32
    %23 = arith.muli %arg0, %c8_i32 : i32
    %24 = vector.broadcast %23 : i32 to vector<8x1xi32>
    %25 = arith.addi %22, %24 : vector<8x1xi32>
    %c8_i32_7 = arith.constant 8 : i32
    %26 = vector.broadcast %c8_i32_7 : i32 to vector<8x1xi32>
    %27 = arith.cmpi slt, %25, %26 : vector<8x1xi32>
    %cst_8 = arith.constant 0.000000e+00 : f32
    %28 = vector.broadcast %cst_8 : f32 to vector<8x1xf32>
    %29 = arith.select %27, %21, %28 : vector<8x1xi1>, vector<8x1xf32>
    %c0_9 = arith.constant 0 : index
    %c0_10 = arith.constant 0 : index
    %30 = vector.load %arg3[%c0_9, %c0_10] : memref<8x1xf32, #tpu.memory_space<vmem>>, vector<8x1xf32>
    tpu.vector_store %arg3[%c0_9, %c0_10], %29 {strides = array<i32>} : memref<8x1xf32, #tpu.memory_space<vmem>>, vector<8x1xf32>,
    return
  }
  func.func @transform_0(%arg0: i32) -> (i32, i32) {
    %c0_i32 = arith.constant 0 : i32
    %c0_i32_0 = arith.constant 0 : i32
    return %arg0, %c0_i32 : i32, i32
  }
  func.func @transform_1(%arg0: i32) -> (i32, i32) {
    %c0_i32 = arith.constant 0 : i32
    %c0_i32_0 = arith.constant 0 : i32
    return %arg0, %c0_i32 : i32, i32
  }
  func.func @transform_2(%arg0: i32) -> (i32, i32) {
    %c0_i32 = arith.constant 0 : i32
    %c0_i32_0 = arith.constant 0 : i32
    return %arg0, %c0_i32 : i32, i32
  }
}

</mosaic_0001>

<bundles_post_ra>
// kernel: tpu_custom_call.1
= control target key start
LH: loop header
LB: loop body
LE: loop exit
PB: predicated region body
PF: predicated region fallthrough
CT: control target
= control target key end

     0   :  { %vm19_vm0 = vcmask 261120   ;;  %v58_v1 = vmov 0   ;;  %v13_v6 = vlaneseq  ;;  %v59_v10 = vmov 0.003125   ;;  %s87_s0 = inlined_call_operand.vmem [shape: f32[8,32], index: 0, kind: input, shape index: {}]   ;;  %s88_s1 = inlined_call_operand.vmem [shape: s32[8,1], index: 1, kind: input, shape index: {}]   ;;  %s89_s2 = inlined_call_operand.vmem [shape: f32[8,1], index: 2, kind: output, shape index: {}]  }
   0x1   :  { %v11_v0 = vld [vmem:[%s87_s0] sm:$0xff]  ;;  %53 = vset.pattern.permute.xlu0 %v58_v1  ;;  %vm45_vm2 = vcmask 7168  }
   0x2   :  { %v20_v2 = vsel %vm19_vm0, %v11_v0, -inf  ;;  %v12_v3 = vld [vmem:[%s88_s1] sm:$0xff]  ;;  %v14_v8 = vand.u32 127, %v13_v6 }
   0x3   :  { %21 = vmax.xlane.f32.xlu0 %v20_v2 }
  0x19   :  { %16 = vperm.xlu0 %53, %v12_v3  }
  0x90   :  { %v22_v4 = vpop.xlane.xlu0 %21 }
  0x91   :  { %v23_v5 = vsub.f32 %v11_v0, %v22_v4 }
  0x93   :  { %v24_v7 = vmul.f32 1.442695, %v23_v5 }
  0x95   :  { %54 = vpow2.f32 %v24_v7 }
  0x98   :  { %v17_v9 = vpop.permute.xlu0 %16 }
  0x99   :  { %vm18_vm1 = vcmp.eq.s32.totalorder %v14_v8, %v17_v9 }
  0x9a   :  { %v29_v11 = vsel %vm18_vm1, 0.903125, %v59_v10 }
  0x9b   :  { %v30_v12 = vmul.f32 %v29_v11, %v11_v0 }
  0x9d   :  { %v31_v15 = vsel %vm19_vm0, %v30_v12, 0.0 }
  0x9f   :  { %v55_v13 = vpop.eup %54 }
  0xa0   :  { %v26_v14 = vsel %vm19_vm0, %v55_v13, 0.0 }
  0xa1   :  { %27 = vadd.xlane.f32.xlu1 %v26_v14 }
  0xa5   :  { %32 = vadd.xlane.f32.xlu1 %v31_v15 }
 0x12e   :  { %v28_v16 = vpop.xlane.xlu1 %27 }
 0x12f   :  { %56 = vlog2.f32 %v28_v16 }
 0x132   :  { %v33_v19 = vpop.xlane.xlu1 %32 }
 0x139   :  { %v57_v17 = vpop.eup %56 }
 0x13a   :  { %v35_v18 = vmul.f32 0.6931472, %v57_v17 }
 0x13c   :  { %v36_v20 = vadd.f32 %v35_v18, %v22_v4 }
 0x13e   :  { %v37_v21 = vsub.f32 %v36_v20, %v33_v19 }
 0x140   :  { %46 = vst.msk [vmem:[%s89_s2] sm:$0xff] %vm45_vm2, %v37_v21 }

</bundles_post_ra>
